<compile_context>
chip_gen: v6e
topology: v6e:2x2x1
jax: 0.10.0
libtpu: 0.0.40
codegen_flags: <defaults>
</compile_context>

<pallas_src>
import jax
import jax.numpy as jnp
from jax.experimental import pallas as pl
from jax.experimental.pallas import tpu as pltpu


def _local_att_kernel(x_ref, pool_ref, eh_ref, ew_ref, w1f_ref, b1_ref,
                      whw_ref, out_ref):
    """Processes a (B, C, H*W) lane-dense block of the batch."""
    B, C, HW = x_ref.shape
    HpW = pool_ref.shape[1]
    mid = w1f_ref.shape[0]

    x = x_ref[...]                                   # (B, C, HW) lane-dense
    x2 = x.reshape(B * C, HW)

    # (1) H/W mean pooling of the whole block: ONE MXU matmul, M = B*C.
    #     pooled[:, :H] == mean over w (x_h), pooled[:, H:] == mean over h (x_w)
    pooled = jnp.dot(x2, pool_ref[...],
                     preferred_element_type=jnp.float32)          # (B*C, H+W)
    pooled3 = pooled.reshape(B, C, HpW)

    # (2) squeeze 1x1 conv with folded BN + ReLU: one batched matmul over the
    #     whole block; the bias broadcast happens once (not per batch item).
    w1f_b = jnp.broadcast_to(w1f_ref[...], (B, mid, C))
    z = jnp.maximum(
        jnp.einsum('bmc,bcx->bmx', w1f_b, pooled3,
                   preferred_element_type=jnp.float32) + b1_ref[...],
        0.0)                                                       # (B, mid, H+W)

    # (3) expand 1x1 convs (F_h ++ F_w concatenated into one (2C, mid) weight).
    #     K = mid is tiny, so do it with `mid` VPU broadcast multiply-adds and a
    #     single fused sigmoid region instead of padded MXU pushes.
    whw = whw_ref[...]                                             # (2C, mid)
    acc = whw[None, :, 0:1] * z[:, 0:1, :]
    for m in range(1, mid):
        acc = acc + whw[None, :, m:m + 1] * z[:, m:m + 1, :]
    s = jax.nn.sigmoid(acc)                                        # (B, 2C, H+W)

    s_h = s[:, :C, :].reshape(B * C, HpW)   # sigmoid(F_h(z)); only cols < H used
    s_w = s[:, C:, :].reshape(B * C, HpW)   # sigmoid(F_w(z)); only cols >= H used

    # (4) gate[., h*W + w] = s_h[., h] * s_w[., w], built lane-dense with two
    #     big MXU matmuls against constant 0/1 expansion matrices (zero rows of
    #     eh/ew select the correct halves, so no sub-vreg lane slicing).
    gate = (jnp.dot(s_h, eh_ref[...], preferred_element_type=jnp.float32)
            * jnp.dot(s_w, ew_ref[...], preferred_element_type=jnp.float32))  # (B*C, HW)

    out_ref[...] = (x * gate.reshape(B, C, HW)).astype(out_ref.dtype)


def _pick_batch_block(n, per_item_bytes, max_block_bytes=4 << 20, min_steps=4):
    """Largest batch block whose tile fits ~max_block_bytes while, when the batch
    allows it, keeping >= min_steps grid steps (>= 2 per v7x TensorCore)."""
    divisors = [d for d in range(1, n + 1) if n % d == 0]
    fitting = [d for d in divisors if d * per_item_bytes <= max_block_bytes] or [1]
    for steps in (min_steps, 2, 1):
        good = [d for d in fitting if n // d >= steps]
        if good:
            return max(good)
    return 1


def local_att_pallas(x, params, *, batch_block=None):
    """x: (N, C, H, W) NCHW float32; params: raw module params (BN folded here)."""
    w1, gamma, beta, rmean, rvar, wh, ww = params
    N, C, H, W = x.shape
    HW = H * W
    dt = x.dtype
    f32 = jnp.float32

    # ---- eval-mode BN fold into the squeeze conv (traced once under jit) ----
    scale = gamma / jnp.sqrt(rvar + 1e-5)             # (mid, 1)
    w1f = (w1 * scale).astype(f32)                    # (mid, C)  row-scaled weights
    b1 = (beta - rmean * scale).astype(f32)           # (mid, 1)  folded bias
    whw = jnp.concatenate([wh, ww], axis=0).astype(f32)           # (2C, mid)

    # ---- constant pooling / expansion operators (built in f32) --------------
    f = jnp.arange(HW)
    Ph = ((f[:, None] // W) == jnp.arange(H)[None, :]).astype(f32)   # (HW, H)
    Pw = ((f[:, None] % W) == jnp.arange(W)[None, :]).astype(f32)    # (HW, W)
    pool = jnp.concatenate([Ph / W, Pw / H], axis=1)                 # (HW, H+W)
    eh = jnp.concatenate([Ph.T, jnp.zeros((W, HW), f32)], axis=0)    # (H+W, HW)
    ew = jnp.concatenate([jnp.zeros((H, HW), f32), Pw.T], axis=0)    # (H+W, HW)

    # ---- batch blocking ------------------------------------------------------
    if batch_block is None:
        batch_block = _pick_batch_block(N, C * HW * dt.itemsize)
    assert N % batch_block == 0, "batch must be divisible by batch_block"
    grid_n = N // batch_block

    # lane-dense view of the input (free reshape for contiguous NCHW)
    x_flat = x.reshape(N, C, HW)

    def full_spec(a):
        nd = a.ndim
        return pl.BlockSpec(a.shape, lambda n, nd=nd: (0,) * nd)

    blk = pl.BlockSpec((batch_block, C, HW), lambda n: (n, 0, 0))

    out_flat = pl.pallas_call(
        _local_att_kernel,
        out_shape=jax.ShapeDtypeStruct((N, C, HW), dt),
        grid_spec=pltpu.PrefetchScalarGridSpec(
            num_scalar_prefetch=0,
            grid=(grid_n,),
            in_specs=[blk,
                      full_spec(pool), full_spec(eh), full_spec(ew),
                      full_spec(w1f), full_spec(b1), full_spec(whw)],
            out_specs=blk,
        ),
        compiler_params=pltpu.CompilerParams(
            dimension_semantics=("parallel",),
            vmem_limit_bytes=48 << 20),   # v5e's 16 MiB default is too small for 4 MiB blocks
    )(x_flat, pool, eh, ew, w1f, b1, whw)

    return out_flat.reshape(N, C, H, W)


def local_att_ref(x, params):
    """Pure-JAX reference reproducing the PyTorch forward (BN in eval mode)."""
    w1, gamma, beta, rmean, rvar, wh, ww = params
    x_h = jnp.mean(x, axis=3)                                     # (N, C, H)
    x_w = jnp.mean(x, axis=2)                                     # (N, C, W)
    y_h = jnp.einsum('mc,nch->nmh', w1, x_h)
    y_w = jnp.einsum('mc,ncw->nmw', w1, x_w)
    g, b = gamma[:, 0], beta[:, 0]
    rm, inv = rmean[:, 0], 1.0 / jnp.sqrt(rvar[:, 0] + 1e-5)
    bn = lambda y: (y - rm[None, :, None]) * inv[None, :, None] * g[None, :, None] + b[None, :, None]
    z_h = jax.nn.relu(bn(y_h))
    z_w = jax.nn.relu(bn(y_w))
    s_h = jax.nn.sigmoid(jnp.einsum('cm,nmh->nch', wh, z_h))      # (N, C, H)
    s_w = jax.nn.sigmoid(jnp.einsum('cm,nmw->ncw', ww, z_w))      # (N, C, W)
    return x * s_h[:, :, :, None] * s_w[:, :, None, :]


if __name__ == "__main__":
    # module config: channel=64, reduction=16 -> mid = 4
    N, C, H, W = 2, 64, 16, 16
    reduction = 16
    mid = C // reduction

    key = jax.random.PRNGKey(0)
    kx, k1, k2, k3, k4, k5, k6, k7 = jax.random.split(key, 8)

    x = jax.random.normal(kx, (N, C, H, W), dtype=jnp.float32)

    # Deterministic synthetic parameters (1x1 conv weights squeezed from (o,i,1,1)).
    w1 = jax.random.normal(k1, (mid, C), jnp.float32) / jnp.sqrt(C)      # conv_1x1.weight
    wh = jax.random.normal(k2, (C, mid), jnp.float32) / jnp.sqrt(mid)    # F_h.weight
    ww = jax.random.normal(k3, (C, mid), jnp.float32) / jnp.sqrt(mid)    # F_w.weight
    gamma = 1.0 + 0.1 * jax.random.normal(k4, (mid, 1), jnp.float32)     # bn.weight
    beta = 0.1 * jax.random.normal(k5, (mid, 1), jnp.float32)            # bn.bias
    rmean = 0.1 * jax.random.normal(k6, (mid, 1), jnp.float32)           # bn.running_mean
    rvar = 1.0 + 0.1 * jnp.abs(jax.random.normal(k7, (mid, 1), jnp.float32))  # bn.running_var

    params = (w1, gamma, beta, rmean, rvar, wh, ww)

    # Jit the wrapper so BN fold + constant operators are materialized once,
    # fused with the pallas_call launch.
    fn = jax.jit(lambda xx: local_att_pallas(xx, params))
    out = jax.block_until_ready(fn(x))

    ref = local_att_ref(x, params)
    assert out.shape == (N, C, H, W)
    err = jnp.max(jnp.abs(out - ref))
    assert jnp.allclose(out, ref, atol=1e-4, rtol=1e-4), f"max abs err = {err}"

    print("KERNEL_OK")
</pallas_src>

<mosaic_0001>
module attributes {stable_mosaic.version = 11 : i64} {
  func.func @_local_att_kernel(%arg0: i32, %arg1: memref<1x64x256xf32, #tpu.memory_space<vmem>>, %arg2: memref<256x32xf32, #tpu.memory_space<vmem>>, %arg3: memref<32x256xf32, #tpu.memory_space<vmem>>, %arg4: memref<32x256xf32, #tpu.memory_space<vmem>>, %arg5: memref<4x64xf32, #tpu.memory_space<vmem>>, %arg6: memref<4x1xf32, #tpu.memory_space<vmem>>, %arg7: memref<128x4xf32, #tpu.memory_space<vmem>>, %arg8: memref<1x64x256xf32, #tpu.memory_space<vmem>>) attributes {dimension_semantics = [#tpu.dimension_semantics<parallel>], iteration_bounds = array<i64: 2>, scalar_prefetch = 0 : i64, scratch_operands = 0 : i64, tpu.core_type = #tpu.core_type<tc>, window_params = [{transform_indices = @transform_0, window_bounds = array<i64: 1, 64, 256>}, {pipeline_mode = #tpu.pipeline_mode<synchronous>, transform_indices = @transform_1, window_bounds = array<i64: 256, 32>}, {pipeline_mode = #tpu.pipeline_mode<synchronous>, transform_indices = @transform_2, window_bounds = array<i64: 32, 256>}, {pipeline_mode = #tpu.pipeline_mode<synchronous>, transform_indices = @transform_3, window_bounds = array<i64: 32, 256>}, {pipeline_mode = #tpu.pipeline_mode<synchronous>, transform_indices = @transform_4, window_bounds = array<i64: 4, 64>}, {pipeline_mode = #tpu.pipeline_mode<synchronous>, transform_indices = @transform_5, window_bounds = array<i64: 4, 1>}, {pipeline_mode = #tpu.pipeline_mode<synchronous>, transform_indices = @transform_6, window_bounds = array<i64: 128, 4>}, {transform_indices = @transform_7, window_bounds = array<i64: 1, 64, 256>}]} {
    %c0 = arith.constant 0 : index
    %c0_0 = arith.constant 0 : index
    %c0_1 = arith.constant 0 : index
    %0 = vector.load %arg1[%c0, %c0_0, %c0_1] : memref<1x64x256xf32, #tpu.memory_space<vmem>>, vector<1x64x256xf32>
    %1 = vector.shape_cast %0 : vector<1x64x256xf32> to vector<64x256xf32>
    %c0_2 = arith.constant 0 : index
    %c0_3 = arith.constant 0 : index
    %2 = vector.load %arg2[%c0_2, %c0_3] : memref<256x32xf32, #tpu.memory_space<vmem>>, vector<256x32xf32>
    %cst = arith.constant dense<0.000000e+00> : vector<64x32xf32>
    %3 = tpu.matmul %1, %2, %cst {dimension_numbers = #tpu.dot_dimension_numbers<[1], [0], [0], [1], [0, 0, 1, 1], [], []>} : vector<64x256xf32>, vector<256x32xf32>, vector<64x32xf32> -> vector<64x32xf32>
    %4 = vector.shape_cast %3 : vector<64x32xf32> to vector<1x64x32xf32>
    %c0_4 = arith.constant 0 : index
    %c0_5 = arith.constant 0 : index
    %5 = vector.load %arg5[%c0_4, %c0_5] : memref<4x64xf32, #tpu.memory_space<vmem>>, vector<4x64xf32>
    %6 = vector.shape_cast %5 : vector<4x64xf32> to vector<1x4x64xf32>
    "tpu.trace_start"() <{level = 10 : i32, message = "bmc,bcx->bmx"}> : () -> ()
    %cst_6 = arith.constant dense<0.000000e+00> : vector<1x4x32xf32>
    %7 = tpu.matmul %6, %4, %cst_6 {dimension_numbers = #tpu.dot_dimension_numbers<[2], [1], [1], [2], [0, 0, 0, 1, 1, 2], [0], [0]>} : vector<1x4x64xf32>, vector<1x64x32xf32>, vector<1x4x32xf32> -> vector<1x4x32xf32>
    "tpu.trace_stop"() : () -> ()
    %c0_7 = arith.constant 0 : index
    %c0_8 = arith.constant 0 : index
    %8 = vector.load %arg6[%c0_7, %c0_8] : memref<4x1xf32, #tpu.memory_space<vmem>>, vector<4x1xf32>
    %9 = vector.shape_cast %8 : vector<4x1xf32> to vector<1x4x1xf32>
    %10 = vector.broadcast %9 : vector<1x4x1xf32> to vector<1x4x32xf32>
    %11 = arith.addf %7, %10 : vector<1x4x32xf32>
    %cst_9 = arith.constant 0.000000e+00 : f32
    %12 = vector.broadcast %cst_9 : f32 to vector<1x4x32xf32>
    %13 = arith.maximumf %11, %12 : vector<1x4x32xf32>
    %c0_10 = arith.constant 0 : index
    %c0_11 = arith.constant 0 : index
    %14 = vector.load %arg7[%c0_10, %c0_11] : memref<128x4xf32, #tpu.memory_space<vmem>>, vector<128x4xf32>
    %15 = vector.extract_strided_slice %14 {offsets = [0, 0], sizes = [128, 1], strides = [1, 1]} : vector<128x4xf32> to vector<128x1xf32>
    %16 = vector.shape_cast %15 : vector<128x1xf32> to vector<1x128x1xf32>
    %17 = vector.extract_strided_slice %13 {offsets = [0, 0, 0], sizes = [1, 1, 32], strides = [1, 1, 1]} : vector<1x4x32xf32> to vector<1x1x32xf32>
    %18 = vector.broadcast %16 : vector<1x128x1xf32> to vector<1x128x32xf32>
    %19 = vector.broadcast %17 : vector<1x1x32xf32> to vector<1x128x32xf32>
    %20 = arith.mulf %18, %19 : vector<1x128x32xf32>
    %21 = vector.extract_strided_slice %14 {offsets = [0, 1], sizes = [128, 1], strides = [1, 1]} : vector<128x4xf32> to vector<128x1xf32>
    %22 = vector.shape_cast %21 : vector<128x1xf32> to vector<1x128x1xf32>
    %23 = vector.extract_strided_slice %13 {offsets = [0, 1, 0], sizes = [1, 1, 32], strides = [1, 1, 1]} : vector<1x4x32xf32> to vector<1x1x32xf32>
    %24 = vector.broadcast %22 : vector<1x128x1xf32> to vector<1x128x32xf32>
    %25 = vector.broadcast %23 : vector<1x1x32xf32> to vector<1x128x32xf32>
    %26 = arith.mulf %24, %25 : vector<1x128x32xf32>
    %27 = arith.addf %20, %26 : vector<1x128x32xf32>
    %28 = vector.extract_strided_slice %14 {offsets = [0, 2], sizes = [128, 1], strides = [1, 1]} : vector<128x4xf32> to vector<128x1xf32>
    %29 = vector.shape_cast %28 : vector<128x1xf32> to vector<1x128x1xf32>
    %30 = vector.extract_strided_slice %13 {offsets = [0, 2, 0], sizes = [1, 1, 32], strides = [1, 1, 1]} : vector<1x4x32xf32> to vector<1x1x32xf32>
    %31 = vector.broadcast %29 : vector<1x128x1xf32> to vector<1x128x32xf32>
    %32 = vector.broadcast %30 : vector<1x1x32xf32> to vector<1x128x32xf32>
    %33 = arith.mulf %31, %32 : vector<1x128x32xf32>
    %34 = arith.addf %27, %33 : vector<1x128x32xf32>
    %35 = vector.extract_strided_slice %14 {offsets = [0, 3], sizes = [128, 1], strides = [1, 1]} : vector<128x4xf32> to vector<128x1xf32>
    %36 = vector.shape_cast %35 : vector<128x1xf32> to vector<1x128x1xf32>
    %37 = vector.extract_strided_slice %13 {offsets = [0, 3, 0], sizes = [1, 1, 32], strides = [1, 1, 1]} : vector<1x4x32xf32> to vector<1x1x32xf32>
    %38 = vector.broadcast %36 : vector<1x128x1xf32> to vector<1x128x32xf32>
    %39 = vector.broadcast %37 : vector<1x1x32xf32> to vector<1x128x32xf32>
    %40 = arith.mulf %38, %39 : vector<1x128x32xf32>
    %41 = arith.addf %34, %40 : vector<1x128x32xf32>
    %42 = arith.negf %41 : vector<1x128x32xf32>
    %43 = math.exp %42 : vector<1x128x32xf32>
    %cst_12 = arith.constant 1.000000e+00 : f32
    %44 = vector.broadcast %cst_12 : f32 to vector<1x128x32xf32>
    %45 = arith.addf %44, %43 : vector<1x128x32xf32>
    %46 = arith.divf %44, %45 : vector<1x128x32xf32>
    %47 = vector.extract_strided_slice %46 {offsets = [0, 0, 0], sizes = [1, 64, 32], strides = [1, 1, 1]} : vector<1x128x32xf32> to vector<1x64x32xf32>
    %48 = vector.shape_cast %47 : vector<1x64x32xf32> to vector<64x32xf32>
    %49 = vector.extract_strided_slice %46 {offsets = [0, 64, 0], sizes = [1, 64, 32], strides = [1, 1, 1]} : vector<1x128x32xf32> to vector<1x64x32xf32>
    %50 = vector.shape_cast %49 : vector<1x64x32xf32> to vector<64x32xf32>
    %c0_13 = arith.constant 0 : index
    %c0_14 = arith.constant 0 : index
    %51 = vector.load %arg3[%c0_13, %c0_14] : memref<32x256xf32, #tpu.memory_space<vmem>>, vector<32x256xf32>
    %cst_15 = arith.constant dense<0.000000e+00> : vector<64x256xf32>
    %52 = tpu.matmul %48, %51, %cst_15 {dimension_numbers = #tpu.dot_dimension_numbers<[1], [0], [0], [1], [0, 0, 1, 1], [], []>} : vector<64x32xf32>, vector<32x256xf32>, vector<64x256xf32> -> vector<64x256xf32>
    %c0_16 = arith.constant 0 : index
    %c0_17 = arith.constant 0 : index
    %53 = vector.load %arg4[%c0_16, %c0_17] : memref<32x256xf32, #tpu.memory_space<vmem>>, vector<32x256xf32>
    %cst_18 = arith.constant dense<0.000000e+00> : vector<64x256xf32>
    %54 = tpu.matmul %50, %53, %cst_18 {dimension_numbers = #tpu.dot_dimension_numbers<[1], [0], [0], [1], [0, 0, 1, 1], [], []>} : vector<64x32xf32>, vector<32x256xf32>, vector<64x256xf32> -> vector<64x256xf32>
    %55 = arith.mulf %52, %54 : vector<64x256xf32>
    %56 = vector.shape_cast %55 : vector<64x256xf32> to vector<1x64x256xf32>
    %57 = arith.mulf %0, %56 : vector<1x64x256xf32>
    %c0_19 = arith.constant 0 : index
    %c0_20 = arith.constant 0 : index
    %c0_21 = arith.constant 0 : index
    %58 = vector.load %arg8[%c0_19, %c0_20, %c0_21] : memref<1x64x256xf32, #tpu.memory_space<vmem>>, vector<1x64x256xf32>
    tpu.vector_store %arg8[%c0_19, %c0_20, %c0_21], %57 {strides = array<i32>} : memref<1x64x256xf32, #tpu.memory_space<vmem>>, vector<1x64x256xf32>,
    return
  }
  func.func @transform_0(%arg0: i32) -> (i32, i32, i32) {
    %c0_i32 = arith.constant 0 : i32
    %c0_i32_0 = arith.constant 0 : i32
    %c0_i32_1 = arith.constant 0 : i32
    return %arg0, %c0_i32, %c0_i32_0 : i32, i32, i32
  }
  func.func @transform_1(%arg0: i32) -> (i32, i32) {
    %c0_i32 = arith.constant 0 : i32
    %c0_i32_0 = arith.constant 0 : i32
    %c0_i32_1 = arith.constant 0 : i32
    return %c0_i32, %c0_i32_0 : i32, i32
  }
  func.func @transform_2(%arg0: i32) -> (i32, i32) {
    %c0_i32 = arith.constant 0 : i32
    %c0_i32_0 = arith.constant 0 : i32
    %c0_i32_1 = arith.constant 0 : i32
    return %c0_i32, %c0_i32_0 : i32, i32
  }
  func.func @transform_3(%arg0: i32) -> (i32, i32) {
    %c0_i32 = arith.constant 0 : i32
    %c0_i32_0 = arith.constant 0 : i32
    %c0_i32_1 = arith.constant 0 : i32
    return %c0_i32, %c0_i32_0 : i32, i32
  }
  func.func @transform_4(%arg0: i32) -> (i32, i32) {
    %c0_i32 = arith.constant 0 : i32
    %c0_i32_0 = arith.constant 0 : i32
    %c0_i32_1 = arith.constant 0 : i32
    return %c0_i32, %c0_i32_0 : i32, i32
  }
  func.func @transform_5(%arg0: i32) -> (i32, i32) {
    %c0_i32 = arith.constant 0 : i32
    %c0_i32_0 = arith.constant 0 : i32
    %c0_i32_1 = arith.constant 0 : i32
    return %c0_i32, %c0_i32_0 : i32, i32
  }
  func.func @transform_6(%arg0: i32) -> (i32, i32) {
    %c0_i32 = arith.constant 0 : i32
    %c0_i32_0 = arith.constant 0 : i32
    %c0_i32_1 = arith.constant 0 : i32
    return %c0_i32, %c0_i32_0 : i32, i32
  }
  func.func @transform_7(%arg0: i32) -> (i32, i32, i32) {
    %c0_i32 = arith.constant 0 : i32
    %c0_i32_0 = arith.constant 0 : i32
    %c0_i32_1 = arith.constant 0 : i32
    return %arg0, %c0_i32, %c0_i32_0 : i32, i32, i32
  }
}

</mosaic_0001>

<bundles_post_ra>
// kernel: _lambda_.1
= control target key start
LH: loop header
LB: loop body
LE: loop exit
PB: predicated region body
PF: predicated region fallthrough
CT: control target
= control target key end

     0   :  { %s1748_s24 = smov 0   ;;  %s2365_s0 = inlined_call_operand.vmem [shape: f32[2,64,256], index: 0, kind: input, shape index: {}]   ;;  %s2366_s1 = inlined_call_operand.vmem [shape: f32[256,32], index: 1, kind: input, shape index: {}]   ;;  %s2367_s2 = inlined_call_operand.vmem [shape: f32[32,256], index: 2, kind: input, shape index: {}]   ;;  %s2368_s3 = inlined_call_operand.vmem [shape: f32[32,256], index: 3, kind: input, shape index: {}]   ;;  %s2369_s4 = inlined_call_operand.vmem [shape: f32[4,64], index: 4, kind: input, shape index: {}]   ;;  %s2370_s5 = inlined_call_operand.vmem [shape: f32[4,1], index: 5, kind: input, shape index: {}]   ;;  %s2371_s6 = inlined_call_operand.vmem [shape: f32[128,4], index: 6, kind: input, shape index: {}]   ;;  %s2372_s7 = inlined_call_operand.vmem [shape: f32[2,64,256], index: 7, kind: output, shape index: {}]  }
   0x1 LB: > { %s1420_s25 = sadd.s32 4294967295, %s1700_s24   ;;  %p1424_p0 = scmp.ge.s32.totalorder %s1700_s24, 1  ;;  %s1700_s24 = sphi %s1748_s24, %s17_s24  }
   0x2   : > { %p237_p1 = scmp.lt.s32.totalorder %s1700_s24, 3 }
   0x4   : > { %p238_p2 = pnand %p1424_p0, %p237_p1 }
   0x5   : > { %p269_p3 = scmp.lt.s32.totalorder (!%p238_p2), %s1420_s25, 1 }
   0x6   : > { %241 = sbr.rel (%p238_p2) target bundleno = 783 (0x30f), region = 48 }
   0xb   : > { %v326_v0 = vld [vmem:[%s2366_s1 + $0xf8] sm:$0xff]  ;;  %v325_v2 = vld [vmem:[%s2366_s1 + $0xf0] sm:$0xff]  ;;  %v1702_v4 = vmov 1   ;;  %v324_v5 = vld [vmem:[%s2366_s1 + $0xe8] sm:$0xff]  ;;  %s2374_s25 = smov (!%p269_p3, %s1420_s25), 1  ;;  %v1703_v6 = vmov 3  }
   0xc   : > { %v310_v1 = vld [vmem:[%s2366_s1 + $0x78] sm:$0xff]  ;;  %1466 = vmatprep.subr.mxu0 %v326_v0  ;;  %v309_v3 = vld [vmem:[%s2366_s1 + $0x70] sm:$0xff]  ;;  %1564 = vset.pattern.permute.xlu1 %v1702_v4  ;;  %v308_v7 = vld [vmem:[%s2366_s1 + $0x68] sm:$0xff]  ;;  %s1464_s17 = sshll.u32 %s2374_s25, 7  ;;  %v1704_v28 = vmov 2   ;;  %v1705_v45 = vmov 0  }
   0xd   : > { %1467 = vmatpush3.msra.mxu0 %v310_v1  ;;  %1567 = vset.pattern.permute.xlu0 %v1703_v6  ;;  %v323_v8 = vld [vmem:[%s2366_s1 + $0xe0] sm:$0xff]  ;;  %v322_v10 = vld [vmem:[%s2366_s1 + $0xd8] sm:$0xff]  ;;  %s1796_s28 = scalar_lea.vmem %s2365_s0, %s1464_s17  ;;  %v321_v12 = vld [vmem:[%s2366_s1 + $0xd0] sm:$0xff]  ;;  %v1706_v61 = vmov 0.0   ;;  %vm1707_vm0 = vmmov 0   ;;  %vm439_vm1 = vcmask 523264   ;;  %s2324_s29 = scalar_lea.vmem %s2372_s7, %s1464_s17 }
   0xe   : > { %1468 = vmatprep.subr.mxu0 %v325_v2  ;;  %v307_v9 = vld [vmem:[%s2366_s1 + $0x60] sm:$0xff]  ;;  %v306_v11 = vld [vmem:[%s2366_s1 + $0x58] sm:$0xff]  ;;  %v305_v13 = vld [vmem:[%s2366_s1 + $0x50] sm:$0xff]  ;;  %1123 = vmatprep.mubr.f32.mxu1 %v1706_v61  ;;  %vm1034_vm2 = vcmask 261120  }
   0xf   : > { %1469 = vmatpush3.msra.mxu0 %v309_v3  ;;  %v320_v14 = vld [vmem:[%s2366_s1 + $0xc8] sm:$0xff]  ;;  %v319_v17 = vld [vmem:[%s2366_s1 + $0xc0] sm:$0xff]  ;;  %v318_v19 = vld [vmem:[%s2366_s1 + $0xb8] sm:$0xff] }
  0x10   : > { %1470 = vmatprep.subr.mxu0 %v324_v5  ;;  %v280_v15 = vld [vmem:[%s1796_s28 + $0x8] sm:$0xff]  ;;  %v303_v18 = vld [vmem:[%s2366_s1 + $0x40] sm:$0xff]  ;;  %v302_v20 = vld [vmem:[%s2366_s1 + $0x38] sm:$0xff] }
  0x11   : > { %1471 = vmatpush3.msra.mxu0 %v308_v7  ;;  %v304_v16 = vld [vmem:[%s2366_s1 + $0x48] sm:$0xff]  ;;  %391 = vmatprep.mubr.f32.mxu0 %v280_v15  ;;  %v317_v21 = vld [vmem:[%s2366_s1 + $0xb0] sm:$0xff]  ;;  %v1829_v22 = vld [vmem:[%s2371_s6] sm:$0xff] }
  0x12   : > { %1472 = vmatprep.subr.mxu0 %v323_v8  ;;  %v301_v23 = vld [vmem:[%s2366_s1 + $0x30] sm:$0xff]  ;;  %631 = vperm.xlu1 %1564, %v1829_v22   ;;  %v316_v24 = vld [vmem:[%s2366_s1 + $0xa8] sm:$0xff]  ;;  %v315_v26 = vld [vmem:[%s2366_s1 + $0xa0] sm:$0xff] }
  0x13   : > { %1473 = vmatpush3.msra.mxu0 %v307_v9  ;;  %831 = vperm.xlu0 %1567, %v1829_v22   ;;  %v300_v25 = vld [vmem:[%s2366_s1 + $0x28] sm:$0xff]  ;;  %v299_v27 = vld [vmem:[%s2366_s1 + $0x20] sm:$0xff]  ;;  %v314_v29 = vld [vmem:[%s2366_s1 + $0x98] sm:$0xff] }
  0x14   : > { %1474 = vmatprep.subr.mxu0 %v322_v10  ;;  %v1856_v30 = vld [vmem:[%s2371_s6 + $0x18] sm:$0xff]  ;;  %v313_v32 = vld [vmem:[%s2366_s1 + $0x90] sm:$0xff]  ;;  %v1868_v33 = vld [vmem:[%s2371_s6 + $0x8] sm:$0xff] }
  0x15   : > { %1475 = vmatpush3.msra.mxu0 %v306_v11  ;;  %v298_v31 = vld [vmem:[%s2366_s1 + $0x18] sm:$0xff]  ;;  %v297_v34 = vld [vmem:[%s2366_s1 + $0x10] sm:$0xff]  ;;  %v312_v35 = vld [vmem:[%s2366_s1 + $0x88] sm:$0xff] }
  0x16   : > { %1476 = vmatprep.subr.mxu0 %v321_v12  ;;  %1565 = vset.pattern.permute.xlu1 %v1704_v28  ;;  %v296_v36 = vld [vmem:[%s2366_s1 + $0x8] sm:$0xff]  ;;  %v311_v37 = vld [vmem:[%s2366_s1 + $0x80] sm:$0xff]  ;;  %v516_v38 = vld [vmem:[%s2371_s6 + $0x10] sm:$0xff] }
  0x17   : > { %1477 = vmatpush3.msra.mxu0 %v305_v13  ;;  %731 = vperm.xlu1 %1565, %v1829_v22   ;;  %v295_v39 = vld [vmem:[%s2366_s1] sm:$0xff]  ;;  %v282_v41 = vld [vmem:[%s1796_s28 + $0x18] sm:$0xff]  ;;  %v519_v42 = vld [vmem:[%s2371_s6 + $0x28] sm:$0xff] }
  0x18   : > { %1478 = vmatprep.subr.mxu0 %v320_v14  ;;  %843 = vperm.xlu0 %1567, %v1856_v30   ;;  %v279_v40 = vld [vmem:[%s1796_s28] sm:$0xff]  ;;  %v281_v43 = vld [vmem:[%s1796_s28 + $0x10] sm:$0xff]  ;;  %v284_v44 = vld [vmem:[%s1796_s28 + $0x28] sm:$0xff] }
  0x19   : > { %1479 = vmatpush3.msra.mxu0 %v304_v16  ;;  %v283_v46 = vld [vmem:[%s1796_s28 + $0x20] sm:$0xff]  ;;  %v286_v47 = vld [vmem:[%s1796_s28 + $0x38] sm:$0xff]  ;;  %v285_v48 = vld [vmem:[%s1796_s28 + $0x30] sm:$0xff] }
  0x1a   : > { %1480 = vmatprep.subr.mxu0 %v319_v17  ;;  %v288_v49 = vld [vmem:[%s1796_s28 + $0x48] sm:$0xff]  ;;  %v287_v50 = vld [vmem:[%s1796_s28 + $0x40] sm:$0xff]  ;;  %v290_v51 = vld [vmem:[%s1796_s28 + $0x58] sm:$0xff] }
  0x1b   : > { %1481 = vmatpush3.msra.mxu0 %v303_v18  ;;  %1566 = vset.pattern.permute.xlu1 %v1702_v4  ;;  %v289_v52 = vld [vmem:[%s1796_s28 + $0x50] sm:$0xff]  ;;  %v292_v53 = vld [vmem:[%s1796_s28 + $0x68] sm:$0xff]  ;;  %v291_v54 = vld [vmem:[%s1796_s28 + $0x60] sm:$0xff] }
  0x1c   : > { %1482 = vmatprep.subr.mxu0 %v318_v19  ;;  %635 = vperm.xlu1 %1566, %v1868_v33   ;;  %v294_v55 = vld [vmem:[%s1796_s28 + $0x78] sm:$0xff]  ;;  %v293_v56 = vld [vmem:[%s1796_s28 + $0x70] sm:$0xff]  ;;  %v518_v57 = vld [vmem:[%s2371_s6 + $0x20] sm:$0xff] }
  0x1d   : > { %1483 = vmatpush3.msra.mxu0 %v302_v20  ;;  %1576 = vset.pattern.permute.xlu0 %v1702_v4  ;;  %v1930_v58 = vld [vmem:[%s2371_s6 + $0x30] sm:$0xff]  ;;  %v521_v59 = vld [vmem:[%s2371_s6 + $0x38] sm:$0xff]  ;;  %v522_v60 = vld [vmem:[%s2371_s6 + $0x40] sm:$0xff] }
  0x1e   : > { %1484 = vmatprep.subr.mxu0 %v317_v21  ;;  %639 = vperm.xlu0 %1576, %v516_v38   ;;  %v523_v62 = vld [vmem:[%s2371_s6 + $0x48] sm:$0xff]  ;;  %v524_v63 = vld [vmem:[%s2371_s6 + $0x50] sm:$0xff]  ;;  %v433_v0 = vld [vmem:[%s2370_s5] sm:$0xf] }
  0x1f   : > { %1485 = vmatpush3.msra.mxu0 %v301_v23  ;;  %v525_v1 = vld [vmem:[%s2371_s6 + $0x58] sm:$0xff]  ;;  %v526_v2 = vld [vmem:[%s2371_s6 + $0x60] sm:$0xff]  ;;  %v527_v3 = vld [vmem:[%s2371_s6 + $0x68] sm:$0xff] }
  0x20   : > { %1486 = vmatprep.subr.mxu0 %v316_v24  ;;  %1568 = vset.pattern.permute.xlu1 %v1704_v28  ;;  %v528_v5 = vld [vmem:[%s2371_s6 + $0x70] sm:$0xff]  ;;  %v529_v7 = vld [vmem:[%s2371_s6 + $0x78] sm:$0xff] }
  0x21   : > { %1487 = vmatpush3.msra.mxu0 %v300_v25  ;;  %735 = vperm.xlu1 %1568, %v1868_v33  }
  0x22   : > { %1488 = vmatprep.subr.mxu0 %v315_v26  ;;  %651 = vperm.xlu0 %1576, %v519_v42  }
  0x23   : > { %1489 = vmatpush3.msra.mxu0 %v299_v27 }
  0x24   : > { %1490 = vmatprep.subr.mxu0 %v314_v29 }
  0x25   : > { %1491 = vmatpush3.msra.mxu0 %v298_v31  ;;  %1569 = vset.pattern.permute.xlu1 %v1705_v45 }
  0x26   : > { %1492 = vmatprep.subr.mxu0 %v313_v32  ;;  %542 = vperm.xlu1 %1569, %v516_v38  }
  0x27   : > { %1493 = vmatpush3.msra.mxu0 %v297_v34  ;;  %663 = vperm.xlu0 %1576, %v522_v60  }
  0x28   : > { %1494 = vmatprep.subr.mxu0 %v312_v35 }
  0x29   : > { %1495 = vmatpush3.msra.mxu0 %v296_v36 }
  0x2a   : > { %1496 = vmatprep.subr.mxu0 %v311_v37  ;;  %1570 = vset.pattern.permute.xlu1 %v1703_v6 }
  0x2b   : > { %1497 = vmatpush3.msra.mxu0 %v295_v39  ;;  %835 = vperm.xlu1 %1570, %v1868_v33  }
  0x2c   : > { %392 = vmatmul.mubr.f32.vlgmr.msra.gmra.mxu0 %v279_v40  ;;  %1587 = vset.pattern.permute.xlu0 %v1705_v45 }
  0x2d   : > { %396 = vmatprep.mubr.f32.mxu0 %v282_v41  ;;  %1531 = vmatprep.subr.mxu0 %v1706_v61 }
  0x2e   : > { %436 = vperm.xlu0 %1587, %v433_v0   ;;  %v1179_v0 = vld [vmem:[%s2368_s3 + $0x38] sm:$0xff] }
  0x2f   : > { %1571 = vset.pattern.permute.xlu1 %v1704_v28 }
  0x30   : > { %397 = vmatmul.mubr.f32.gmra.mxu0 %v281_v43  ;;  %739 = vperm.xlu1 %1571, %v516_v38  }
  0x31   : > { %401 = vmatprep.mubr.f32.mxu0 %v284_v44 }
  0x32   : > { %532 = vperm.xlu0 %1587, %v1829_v22  }
  0x34   : > { %402 = vmatmul.mubr.f32.gmra.mxu0 %v283_v46  ;;  %1572 = vset.pattern.permute.xlu1 %v1702_v4 }
  0x35   : > { %406 = vmatprep.mubr.f32.mxu0 %v286_v47  ;;  %643 = vperm.xlu1 %1572, %v1856_v30   ;;  %v1033_v47 = vld [vmem:[%s2367_s2 + $0x38] sm:$0xff] }
  0x36   : > { %537 = vperm.xlu0 %1587, %v1868_v33   ;;  %1083 = vmatprep.subr.mxu1 %v1033_v47 }
  0x38   : > { %407 = vmatmul.mubr.f32.gmra.mxu0 %v285_v48  ;;  %v1032_v48 = vld [vmem:[%s2367_s2 + $0x30] sm:$0xff] }
  0x39   : > { %411 = vmatprep.mubr.f32.mxu0 %v288_v49  ;;  %1573 = vset.pattern.permute.xlu1 %v1703_v6  ;;  %v1031_v49 = vld [vmem:[%s2367_s2 + $0x28] sm:$0xff] }
  0x3a   : > { %839 = vperm.xlu1 %1573, %v516_v38   ;;  %547 = vperm.xlu0 %1587, %v1856_v30  }
  0x3b   : > { %1084 = vmatpush1.msra.mxu1 %v1032_v48 }
  0x3c   : > { %412 = vmatmul.mubr.f32.gmra.mxu0 %v287_v50  ;;  %v1030_v50 = vld [vmem:[%s2367_s2 + $0x20] sm:$0xff]  ;;  %1085 = vmatprep.subr.mxu1 %v1031_v49 }
  0x3d   : > { %416 = vmatprep.mubr.f32.mxu0 %v290_v51  ;;  %v1029_v51 = vld [vmem:[%s2367_s2 + $0x18] sm:$0xff]  ;;  %1086 = vmatpush1.msra.mxu1 %v1030_v50 }
  0x3e   : > { %1574 = vset.pattern.permute.xlu1 %v1705_v45  ;;  %562 = vperm.xlu0 %1587, %v1930_v58  }
  0x3f   : > { %552 = vperm.xlu1 %1574, %v518_v57   ;;  %1087 = vmatprep.subr.mxu1 %v1029_v51 }
  0x40   : > { %417 = vmatmul.mubr.f32.gmra.mxu0 %v289_v52  ;;  %v1028_v52 = vld [vmem:[%s2367_s2 + $0x10] sm:$0xff] }
  0x41   : > { %421 = vmatprep.mubr.f32.mxu0 %v292_v53  ;;  %v1027_v53 = vld [vmem:[%s2367_s2 + $0x8] sm:$0xff]  ;;  %1088 = vmatpush1.msra.mxu1 %v1028_v52 }
  0x42   : > { %577 = vperm.xlu0 %1587, %v523_v62   ;;  %1089 = vmatprep.subr.mxu1 %v1027_v53 }
  0x43   : > { %1575 = vset.pattern.permute.xlu1 %v1702_v4 }
  0x44   : > { %422 = vmatmul.mubr.f32.gmra.mxu0 %v291_v54  ;;  %647 = vperm.xlu1 %1575, %v518_v57  }
  0x45   : > { %426 = vmatprep.mubr.f32.mxu0 %v294_v55  ;;  %v1026_v55 = vld [vmem:[%s2367_s2] sm:$0xff] }
  0x46   : > { %592 = vperm.xlu0 %1587, %v526_v2   ;;  %1090 = vmatpush1.msra.mxu1 %v1026_v55 }
  0x47   : > { %1228 = vmatprep.subr.mxu1 %v1179_v0 }
  0x48   : > { %427 = vmatmul.mubr.f32.gmra.mxu0 %v293_v56  ;;  %1577 = vset.pattern.permute.xlu1 %v1704_v28 }
  0x49   : > { %747 = vperm.xlu1 %1577, %v518_v57   ;;  %1547 = vmatprep.mubr.msk.f32.mxu0 %vm1707_vm0, %v1706_v61 }
  0x4a   : > { %1598 = vset.pattern.permute.xlu0 %v1704_v28 }
  0x4b   : > { %743 = vperm.xlu0 %1598, %v1856_v30   ;;  %v432_v30 = vld [vmem:[%s2369_s4] sm:$0xf] }
  0x4d   : > { %1578 = vset.pattern.permute.xlu1 %v1705_v45 }
  0x4e   : > { %557 = vperm.xlu1 %1578, %v519_v42  }
  0x4f   : > { %755 = vperm.xlu0 %1598, %v1930_v58  }
  0x52   : > { %1579 = vset.pattern.permute.xlu1 %v1703_v6 }
  0x53   : > { %847 = vperm.xlu1 %1579, %v518_v57   ;;  %767 = vperm.xlu0 %1598, %v523_v62  }
  0x57   : > { %1580 = vset.pattern.permute.xlu1 %v1704_v28  ;;  %779 = vperm.xlu0 %1598, %v526_v2  }
  0x58   : > { %751 = vperm.xlu1 %1580, %v519_v42  }
  0x5b   : > { %1601 = vset.pattern.permute.xlu0 %v1703_v6 }
  0x5c   : > { %1581 = vset.pattern.permute.xlu1 %v1702_v4  ;;  %855 = vperm.xlu0 %1601, %v1930_v58  }
  0x5d   : > { %655 = vperm.xlu1 %1581, %v1930_v58  }
  0x60   : > { %867 = vperm.xlu0 %1601, %v523_v62  }
  0x61   : > { %1582 = vset.pattern.permute.xlu1 %v1703_v6 }
  0x62   : > { %851 = vperm.xlu1 %1582, %v519_v42  }
  0x64   : > { %879 = vperm.xlu0 %1601, %v526_v2  }
  0x66   : > { %1583 = vset.pattern.permute.xlu1 %v1705_v45 }
  0x67   : > { %567 = vperm.xlu1 %1583, %v521_v59  }
  0x68   : > { %1604 = vset.pattern.permute.xlu0 %v1702_v4 }
  0x69   : > { %675 = vperm.xlu0 %1604, %v525_v1  }
  0x6b   : > { %1584 = vset.pattern.permute.xlu1 %v1702_v4 }
  0x6c   : > { %659 = vperm.xlu1 %1584, %v521_v59  }
  0x6d   : > { %687 = vperm.xlu0 %1604, %v528_v5  }
  0x70   : > { %1585 = vset.pattern.permute.xlu1 %v1704_v28 }
  0x71   : > { %759 = vperm.xlu1 %1585, %v521_v59   ;;  %1609 = vset.pattern.permute.xlu0 %v1705_v45 }
  0x72   : > { %607 = vperm.xlu0 %1609, %v529_v7  }
  0x75   : > { %1586 = vset.pattern.permute.xlu1 %v1705_v45 }
  0x76   : > { %572 = vperm.xlu1 %1586, %v522_v60   ;;  %1612 = vset.pattern.permute.xlu0 %v1704_v28 }
  0x77   : > { %791 = vperm.xlu0 %1612, %v529_v7  }
  0x7a   : > { %1588 = vset.pattern.permute.xlu1 %v1703_v6 }
  0x7b   : > { %859 = vperm.xlu1 %1588, %v521_v59   ;;  %1613 = vset.pattern.permute.xlu0 %v1703_v6 }
  0x7f   : > { %1589 = vset.pattern.permute.xlu1 %v1704_v28 }
  0x80   : > { %763 = vperm.xlu1 %1589, %v522_v60  }
  0x84   : > { %1590 = vset.pattern.permute.xlu1 %v1702_v4 }
  0x85   : > { %667 = vperm.xlu1 %1590, %v523_v62  }
  0x89   : > { %1591 = vset.pattern.permute.xlu1 %v1703_v6 }
  0x8a   : > { %863 = vperm.xlu1 %1591, %v522_v60  }
  0x8d   : > { %v2016_v31 = vpop.permute.xlu1 %631 }
  0x8e   : > { %1592 = vset.pattern.permute.xlu1 %v1705_v45  ;;  %v832_v58 = vpop.permute.xlu0 %831 }
  0x8f   : > { %582 = vperm.xlu1 %1592, %v524_v63  }
  0x92   : > { %v2018_v32 = vpop.permute.xlu1 %731 }
  0x93   : > { %1593 = vset.pattern.permute.xlu1 %v1702_v4  ;;  %v2080_v60 = vpop.permute.xlu0 %843 }
  0x94   : > { %671 = vperm.xlu1 %1593, %v524_v63  }
  0x97   : > { %v2020_v33 = vpop.permute.xlu1 %635 }
  0x98   : > { %1594 = vset.pattern.permute.xlu1 %v1704_v28 }
  0x99   : > { %771 = vperm.xlu1 %1594, %v524_v63  }
  0x9c   : > { %v2022_v34 = vpop.permute.xlu1 %735 }
  0x9d   : > { %1595 = vset.pattern.permute.xlu1 %v1705_v45 }
  0x9e   : > { %587 = vperm.xlu1 %1595, %v525_v1  }
  0xa1   : > { %v2024_v35 = vpop.permute.xlu1 %542 }
  0xa2   : > { %1596 = vset.pattern.permute.xlu1 %v1703_v6 }
  0xa3   : > { %871 = vperm.xlu1 %1596, %v524_v63   ;;  %v640_v63 = vpop.permute.xlu0 %639 }
  0xa6   : > { %v2026_v36 = vpop.permute.xlu1 %835 }
  0xa7   : > { %1597 = vset.pattern.permute.xlu1 %v1704_v28 }
  0xa8   : > { %775 = vperm.xlu1 %1597, %v525_v1  }
  0xab   : > { %v2028_v37 = vpop.permute.xlu1 %739 }
  0xac   : > { %1599 = vset.pattern.permute.xlu1 %v1702_v4 }
  0xad   : > { %679 = vperm.xlu1 %1599, %v526_v2   ;;  %v2089_v2 = vpop.permute.xlu0 %651 }
  0xb0   : > { %v2030_v38 = vpop.permute.xlu1 %643 }
  0xb1   : > { %1600 = vset.pattern.permute.xlu1 %v1703_v6 }
  0xb2   : > { %875 = vperm.xlu1 %1600, %v525_v1  }
  0xb5   : > { %v2032_v39 = vpop.permute.xlu1 %839 }
  0xb6   : > { %1602 = vset.pattern.permute.xlu1 %v1705_v45 }
  0xb7   : > { %597 = vperm.xlu1 %1602, %v527_v3  }
  0xba   : > { %v2034_v40 = vpop.permute.xlu1 %552 }
  0xbb   : > { %1603 = vset.pattern.permute.xlu1 %v1702_v4 }
  0xbc   : > { %683 = vperm.xlu1 %1603, %v527_v3  }
  0xbf   : > { %v2036_v41 = vpop.permute.xlu1 %647 }
  0xc0   : > { %1605 = vset.pattern.permute.xlu1 %v1704_v28 }
  0xc1   : > { %783 = vperm.xlu1 %1605, %v527_v3  }
  0xc4   : > { %v2038_v42 = vpop.permute.xlu1 %747 }
  0xc5   : > { %1606 = vset.pattern.permute.xlu1 %v1705_v45 }
  0xc6   : > { %602 = vperm.xlu1 %1606, %v528_v5  }
  0xc9   : > { %v2040_v43 = vpop.permute.xlu1 %557 }
  0xca   : > { %1607 = vset.pattern.permute.xlu1 %v1703_v6 }
  0xcb   : > { %883 = vperm.xlu1 %1607, %v527_v3  }
  0xce   : > { %v2042_v44 = vpop.permute.xlu1 %847 }
  0xcf   : > { %1608 = vset.pattern.permute.xlu1 %v1704_v28 }
  0xd0   : > { %787 = vperm.xlu1 %1608, %v528_v5  }
  0xd3   : > { %v2044_v45 = vpop.permute.xlu1 %751 }
  0xd4   : > { %1610 = vset.pattern.permute.xlu1 %v1702_v4 }
  0xd5   : > { %691 = vperm.xlu1 %1610, %v529_v7  }
  0xd8   : > { %v2046_v46 = vpop.permute.xlu1 %655 }
  0xd9   : > { %1611 = vset.pattern.permute.xlu1 %v1703_v6 }
  0xda   : > { %887 = vperm.xlu1 %1611, %v528_v5   ;;  %v2093_v5 = vpop.permute.xlu0 %663 }
  0xdd   : > { %v2069_v54 = vpop.permute.xlu1 %851 }
  0xde   : > { %891 = vperm.xlu1 %1611, %v529_v7  }
  0xe2   : > { %v2074_v56 = vpop.permute.xlu1 %567 }
  0xe7   : > { %v2076_v57 = vpop.permute.xlu1 %659 }
  0xec   : > { %v1498_v8 = vpop.f32.mrf.mxu0  ;;  %v2078_v59 = vpop.permute.xlu1 %759 }
  0xee   : > { %v1499_v9 = vpop.f32.mrf.mxu0 }
  0xef   : > { %v1500_v29 = vadd.f32 %v1499_v9, %v1498_v8  ;;  %v437_v8 = vpop.permute.xlu0 %436 }
  0xf0   : > { %v1501_v10 = vpop.f32.mrf.mxu0 }
  0xf1   : > { %v2082_v62 = vpop.permute.xlu1 %572 }
  0xf2   : > { %v1502_v11 = vpop.f32.mrf.mxu0 }
  0xf3   : > { %v1503_v28 = vadd.f32 %v1502_v11, %v1501_v10  ;;  %v533_v10 = vpop.permute.xlu0 %532 }
  0xf4   : > { %v1504_v12 = vpop.f32.mrf.mxu0 }
  0xf6   : > { %v1505_v13 = vpop.f32.mrf.mxu0  ;;  %v2087_v1 = vpop.permute.xlu1 %859 }
  0xf7   : > { %v1506_v27 = vadd.f32 %v1505_v13, %v1504_v12  ;;  %v538_v12 = vpop.permute.xlu0 %537 }
  0xf8   : > { %v1507_v4 = vpop.f32.mrf.mxu0 }
  0xfa   : > { %v1508_v14 = vpop.f32.mrf.mxu0 }
  0xfb   : > { %v1509_v26 = vadd.f32 %v1508_v14, %v1507_v4  ;;  %v2091_v3 = vpop.permute.xlu1 %763  ;;  %v548_v4 = vpop.permute.xlu0 %547 }
  0xfc   : > { %v1510_v15 = vpop.f32.mrf.mxu0 }
  0xfe   : > { %v1511_v16 = vpop.f32.mrf.mxu0 }
  0xff   : > { %v1512_v25 = vadd.f32 %v1511_v16, %v1510_v15  ;;  %v2105_v15 = vpop.permute.xlu0 %562 }
 0x100   : > { %v1513_v17 = vpop.f32.mrf.mxu0  ;;  %v2095_v7 = vpop.permute.xlu1 %667 }
 0x102   : > { %v1514_v18 = vpop.f32.mrf.mxu0 }
 0x103   : > { %v1515_v6 = vadd.f32 %v1514_v18, %v1513_v17  ;;  %v2109_v17 = vpop.permute.xlu0 %577 }
 0x104   : > { %v1516_v19 = vpop.f32.mrf.mxu0 }
 0x105   : > { %v2097_v9 = vpop.permute.xlu1 %863 }
 0x106   : > { %v1517_v20 = vpop.f32.mrf.mxu0 }
 0x107   : > { %v1518_v24 = vadd.f32 %v1517_v20, %v1516_v19  ;;  %v2113_v19 = vpop.permute.xlu0 %592  ;;  %v610_v20 = vlaneseq }
 0x108   : > { %v1519_v21 = vpop.f32.mrf.mxu0 }
 0x10a   : > { %v1520_v22 = vpop.f32.mrf.mxu0  ;;  %v2099_v11 = vpop.permute.xlu1 %582 }
 0x10b   : > { %v1521_v23 = vadd.f32 %v1520_v22, %v1519_v21  ;;  %v744_v22 = vpop.permute.xlu0 %743 }
 0x10d   : > { %1532 = vmatpush3.msra.mxu0 %v1521_v23  ;;  %v611_v23 = vshrl.u32 %v610_v20, 7 }
 0x10e   : > { %1533 = vmatprep.subr.mxu0 %v1706_v61 }
 0x10f   : > { %1534 = vmatpush3.msra.mxu0 %v1518_v24  ;;  %v2101_v13 = vpop.permute.xlu1 %671  ;;  %v796_v47 = vsub.s32 2, %v611_v23  ;;  %v896_v50 = vsub.s32 3, %v611_v23 }
 0x110   : > { %1535 = vmatprep.subr.mxu0 %v1706_v61 }
 0x111   : > { %1536 = vmatpush3.msra.mxu0 %v1515_v6 }
 0x112   : > { %1537 = vmatprep.subr.mxu0 %v1706_v61 }
 0x113   : > { %1538 = vmatpush3.msra.mxu0 %v1512_v25 }
 0x114   : > { %1539 = vmatprep.subr.mxu0 %v1706_v61  ;;  %v2103_v14 = vpop.permute.xlu1 %771 }
 0x115   : > { %1540 = vmatpush3.msra.mxu0 %v1509_v26  ;;  %v612_v26 = vsub.s32 0, %v611_v23 }
 0x116   : > { %1541 = vmatprep.subr.mxu0 %v1706_v61 }
 0x117   : > { %1542 = vmatpush3.msra.mxu0 %v1506_v27  ;;  %v696_v27 = vsub.s32 1, %v611_v23 }
 0x118   : > { %1543 = vmatprep.subr.mxu0 %v1706_v61 }
 0x119   : > { %1544 = vmatpush3.msra.mxu0 %v1503_v28  ;;  %v2107_v16 = vpop.permute.xlu1 %587  ;;  %v756_v28 = vpop.permute.xlu0 %755 }
 0x11a   : > { %1545 = vmatprep.subr.mxu0 %v1706_v61 }
 0x11b   : > { %1546 = vmatpush3.msra.mxu0 %v1500_v29 }
 0x11c   : > { %1548 = vmatmul.mubr.msk.f32.vlgmr.msra.gmra.mxu0 %vm439_vm1, %v432_v30 }
 0x11d   : > { %v2127_v53 = vpop.permute.xlu0 %767 }
 0x11e   : > { %v2111_v18 = vpop.permute.xlu1 %871 }
 0x123   : > { %v2115_v21 = vpop.permute.xlu1 %775 }
 0x128   : > { %v2117_v6 = vpop.permute.xlu1 %679 }
 0x12d   : > { %v2123_v51 = vpop.permute.xlu1 %875 }
 0x1dc   : > { %v509_v24 = vpop.f32.mrf.mxu0 }
 0x1dd   : > { %v510_v25 = vadd.f32 %v509_v24, %v437_v8 }
 0x1de   : > { %v1549_v29 = vpop.f32.mrf.mxu0 }
 0x1df   : > { %v513_v30 = vmax.f32 %v510_v25, 0.0 }
 0x1e1   : > { %v2119_v48 = vrot.slane %v513_v30, %v612_v26  ;;  %v2121_v49 = vrot.slane %v513_v30, %v696_v27  ;;  %v2125_v52 = vrot.slane %v513_v30, %v796_v47  ;;  %v2129_v55 = vrot.slane %v513_v30, %v896_v50  ;;  %v2144_v30 = vpop.permute.xlu1 %597  ;;  %v2149_v47 = vpop.permute.xlu0 %779 }
 0x1e3   : > { %v614_v0 = vmul.f32 %v2119_v48, %v533_v10  ;;  %v698_v8 = vmul.f32 %v2121_v49, %v2016_v31  ;;  %v615_v20 = vmul.f32 %v2119_v48, %v538_v12  ;;  %v699_v24 = vmul.f32 %v2121_v49, %v2020_v33 }
 0x1e4   : > { %v798_v23 = vmul.f32 %v2125_v52, %v2018_v32  ;;  %v799_v27 = vmul.f32 %v2125_v52, %v2022_v34  ;;  %v616_v29 = vmul.f32 %v2119_v48, %v2024_v35  ;;  %v700_v10 = vmul.f32 %v2121_v49, %v640_v63 }
 0x1e5   : > { %v714_v25 = vadd.f32 %v698_v8, %v614_v0  ;;  %v715_v26 = vadd.f32 %v699_v24, %v615_v20  ;;  %v898_v12 = vmul.f32 %v2129_v55, %v832_v58  ;;  %v899_v33 = vmul.f32 %v2129_v55, %v2026_v36 }
 0x1e6   : > { %v716_v50 = vadd.f32 %v700_v10, %v616_v29  ;;  %v800_v34 = vmul.f32 %v2125_v52, %v2028_v37  ;;  %v617_v0 = vmul.f32 %v2119_v48, %v548_v4  ;;  %v701_v63 = vmul.f32 %v2121_v49, %v2030_v38  ;;  %v856_v10 = vpop.permute.xlu0 %855 }
 0x1e7   : > { %v814_v31 = vadd.f32 %v798_v23, %v714_v25  ;;  %v815_v32 = vadd.f32 %v799_v27, %v715_v26  ;;  %v900_v58 = vmul.f32 %v2129_v55, %v2032_v39  ;;  %v801_v25 = vmul.f32 %v2125_v52, %v744_v22  ;;  %v2163_v27 = vpop.permute.xlu1 %683 }
 0x1e8   : > { %v816_v20 = vadd.f32 %v800_v34, %v716_v50  ;;  %v717_v36 = vadd.f32 %v701_v63, %v617_v0  ;;  %v618_v23 = vmul.f32 %v2119_v48, %v2034_v40  ;;  %v702_v4 = vmul.f32 %v2121_v49, %v2036_v41 }
 0x1e9   : > { %v914_v35 = vadd.f32 %v898_v12, %v814_v31  ;;  %v915_v8 = vadd.f32 %v899_v33, %v815_v32  ;;  %v901_v29 = vmul.f32 %v2129_v55, %v2080_v60  ;;  %v802_v39 = vmul.f32 %v2125_v52, %v2038_v42 }
 0x1ea   : > { %v916_v37 = vadd.f32 %v900_v58, %v816_v20  ;;  %v817_v38 = vadd.f32 %v801_v25, %v717_v36  ;;  %v718_v31 = vadd.f32 %v702_v4, %v618_v23  ;;  %v619_v40 = vmul.f32 %v2119_v48, %v2040_v43 }
 0x1eb   : > { %v1430_v24 = vmul.f32 -1.442695, %v914_v35  ;;  %v1431_v26 = vmul.f32 -1.442695, %v915_v8  ;;  %v902_v41 = vmul.f32 %v2129_v55, %v2042_v44  ;;  %v703_v33 = vmul.f32 %v2121_v49, %v2089_v2 }
 0x1ec   : > { %v1432_v22 = vmul.f32 -1.442695, %v916_v37  ;;  %v917_v12 = vadd.f32 %v901_v29, %v817_v38  ;;  %v818_v32 = vadd.f32 %v802_v39, %v718_v31  ;;  %v803_v60 = vmul.f32 %v2125_v52, %v2044_v45  ;;  %v2186_v45 = vpop.permute.xlu1 %783 }
 0x1ed   : > { %1614 = vpow2.f32 %v1430_v24  ;;  %v620_v42 = vmul.f32 %v2119_v48, %v2105_v15  ;;  %v704_v50 = vmul.f32 %v2121_v49, %v2046_v46  ;;  %v719_v43 = vadd.f32 %v703_v33, %v619_v40  ;;  %v868_v46 = vpop.permute.xlu0 %867 }
 0x1ee   : > { %1616 = vpow2.f32 %v1431_v26  ;;  %v1433_v34 = vmul.f32 -1.442695, %v917_v12  ;;  %v804_v0 = vmul.f32 %v2125_v52, %v756_v28  ;;  %v918_v35 = vadd.f32 %v902_v41, %v818_v32 }
 0x1ef   : > { %1618 = vpow2.f32 %v1432_v22  ;;  %v720_v44 = vadd.f32 %v704_v50, %v620_v42  ;;  %v621_v2 = vmul.f32 %v2119_v48, %v2074_v56  ;;  %v705_v63 = vmul.f32 %v2121_v49, %v2076_v57 }
 0x1f0   : > { %v819_v8 = vadd.f32 %v803_v60, %v719_v43  ;;  %v903_v15 = vmul.f32 %v2129_v55, %v2069_v54  ;;  %v622_v28 = vmul.f32 %v2119_v48, %v2082_v62  ;;  %1620 = vpow2.f32 %v1433_v34  ;;  %v2201_v38 = vpop.permute.xlu1 %602 }
 0x1f1   : > { %v820_v20 = vadd.f32 %v804_v0, %v720_v44  ;;  %v721_v58 = vadd.f32 %v705_v63, %v621_v2  ;;  %v1434_v24 = vmul.f32 -1.442695, %v918_v35  ;;  %v706_v56 = vmul.f32 %v2121_v49, %v2093_v5  ;;  %v2203_v5 = vpop.permute.xlu0 %879 }
 0x1f2   : > { %v919_v36 = vadd.f32 %v903_v15, %v819_v8  ;;  %v904_v57 = vmul.f32 %v2129_v55, %v856_v10  ;;  %v805_v25 = vmul.f32 %v2125_v52, %v2078_v59  ;;  %v623_v54 = vmul.f32 %v2119_v48, %v2109_v17 }
 0x1f3   : > { %v707_v23 = vmul.f32 %v2121_v49, %v2095_v7  ;;  %v722_v4 = vadd.f32 %v706_v56, %v622_v28  ;;  %1622 = vpow2.f32 %v1434_v24  ;;  %v905_v39 = vmul.f32 %v2129_v55, %v2087_v1 }
 0x1f4   : > { %v1435_v26 = vmul.f32 -1.442695, %v919_v36  ;;  %v920_v37 = vadd.f32 %v904_v57, %v820_v20  ;;  %v821_v62 = vadd.f32 %v805_v25, %v721_v58  ;;  %v806_v59 = vmul.f32 %v2125_v52, %v2091_v3  ;;  %v2217_v60 = vpop.permute.xlu1 %883 }
 0x1f5   : > { %v723_v22 = vadd.f32 %v707_v23, %v623_v54  ;;  %v624_v7 = vmul.f32 %v2119_v48, %v2099_v11  ;;  %v708_v31 = vmul.f32 %v2121_v49, %v2101_v13  ;;  %v807_v1 = vmul.f32 %v2125_v52, %v2127_v53  ;;  %v676_v13 = vpop.permute.xlu0 %675  ;;  %v1178_v23 = vld [vmem:[%s2368_s3 + $0x30] sm:$0xff] }
 0x1f6   : > { %1624 = vpow2.f32 %v1435_v26  ;;  %v1436_v40 = vmul.f32 -1.442695, %v920_v37  ;;  %v921_v12 = vadd.f32 %v905_v39, %v821_v62  ;;  %v822_v41 = vadd.f32 %v806_v59, %v722_v4 }
 0x1f7   : > { %v906_v3 = vmul.f32 %v2129_v55, %v2097_v9  ;;  %v823_v42 = vadd.f32 %v807_v1, %v723_v22  ;;  %v907_v11 = vmul.f32 %v2129_v55, %v868_v46  ;;  %v724_v50 = vadd.f32 %v708_v31, %v624_v7 }
 0x1f8   : > { %v1437_v34 = vmul.f32 -1.442695, %v921_v12  ;;  %v808_v0 = vmul.f32 %v2125_v52, %v2103_v14  ;;  %v625_v53 = vmul.f32 %v2119_v48, %v2107_v16  ;;  %v709_v9 = vmul.f32 %v2121_v49, %v676_v13  ;;  %v2229_v20 = vpop.permute.xlu1 %787  ;;  %v1173_v12 = vld [vmem:[%s2368_s3 + $0x8] sm:$0xff] }
 0x1f9   : > { %v922_v43 = vadd.f32 %v906_v3, %v822_v41  ;;  %v923_v2 = vadd.f32 %v907_v11, %v823_v42  ;;  %v626_v15 = vmul.f32 %v2119_v48, %v2113_v19  ;;  %v710_v46 = vmul.f32 %v2121_v49, %v2117_v6  ;;  %v688_v24 = vpop.permute.xlu0 %687  ;;  %v1172_v42 = vld [vmem:[%s2368_s3] sm:$0xff] }
 0x1fa   : > { %v1615_v29 = vpop.eup %1614  ;;  %v824_v63 = vadd.f32 %v808_v0, %v724_v50  ;;  %v908_v16 = vmul.f32 %v2129_v55, %v2111_v18  ;;  %v725_v58 = vadd.f32 %v709_v9, %v625_v53  ;;  %v809_v57 = vmul.f32 %v2125_v52, %v2115_v21  ;;  %v1177_v21 = vld [vmem:[%s2368_s3 + $0x28] sm:$0xff] }
 0x1fb   : > { %v1617_v17 = vpop.eup %1616  ;;  %v978_v10 = vadd.f32 1.0, %v1615_v29  ;;  %v1438_v8 = vmul.f32 -1.442695, %v922_v43  ;;  %v1439_v36 = vmul.f32 -1.442695, %v923_v2  ;;  %v726_v19 = vadd.f32 %v710_v46, %v626_v15  ;;  %v1176_v29 = vld [vmem:[%s2368_s3 + $0x20] sm:$0xff] }
 0x1fc   : > { %v979_v33 = vadd.f32 1.0, %v1617_v17  ;;  %v1619_v32 = vpop.eup %1618  ;;  %v924_v56 = vadd.f32 %v908_v16, %v824_v63  ;;  %v627_v6 = vmul.f32 %v2119_v48, %v2144_v30  ;;  %v711_v25 = vmul.f32 %v2121_v49, %v2163_v27  ;;  %v692_v4 = vpop.permute.xlu1 %691 }
 0x1fd   : > { %1626 = vrcp.f32 %v978_v10  ;;  %v980_v35 = vadd.f32 1.0, %v1619_v32  ;;  %v1621_v44 = vpop.eup %1620  ;;  %v825_v26 = vadd.f32 %v809_v57, %v725_v58  ;;  %v810_v62 = vmul.f32 %v2125_v52, %v2149_v47  ;;  %v1175_v47 = vld [vmem:[%s2368_s3 + $0x18] sm:$0xff]  ;;  %v608_v22 = vpop.permute.xlu0 %607 }
 0x1fe   : > { %1628 = vpow2.f32 %v1436_v40  ;;  %v981_v14 = vadd.f32 1.0, %v1621_v44  ;;  %v628_v30 = vmul.f32 %v2119_v48, %v2201_v38  ;;  %v712_v27 = vmul.f32 %v2121_v49, %v688_v24 }
 0x1ff   : > { %1630 = vrcp.f32 %v979_v33  ;;  %v909_v39 = vmul.f32 %v2129_v55, %v2123_v51  ;;  %v1440_v38 = vmul.f32 -1.442695, %v924_v56  ;;  %v826_v59 = vadd.f32 %v810_v62, %v726_v19  ;;  %v1174_v51 = vld [vmem:[%s2368_s3 + $0x10] sm:$0xff] }
 0x200   : > { %1632 = vpow2.f32 %v1437_v34  ;;  %v1623_v28 = vpop.eup %1622  ;;  %v727_v17 = vadd.f32 %v711_v25, %v627_v6  ;;  %v910_v41 = vmul.f32 %v2129_v55, %v2203_v5  ;;  %v811_v33 = vmul.f32 %v2125_v52, %v2186_v45  ;;  %v888_v13 = vpop.permute.xlu1 %887 }
 0x201   : > { %1634 = vrcp.f32 %v980_v35  ;;  %v982_v18 = vadd.f32 1.0, %v1623_v28  ;;  %v925_v31 = vadd.f32 %v909_v39, %v825_v26  ;;  %v728_v1 = vadd.f32 %v712_v27, %v628_v30  ;;  %v792_v35 = vpop.permute.xlu0 %791 }
 0x202   : > { %1636 = vpow2.f32 %v1438_v8  ;;  %v713_v32 = vmul.f32 %v2121_v49, %v692_v4  ;;  %v629_v3 = vmul.f32 %v2119_v48, %v608_v22  ;;  %v926_v5 = vadd.f32 %v910_v41, %v826_v59 }
 0x203   : > { %v1625_v54 = vpop.eup %1624  ;;  %1638 = vrcp.f32 %v981_v14  ;;  %v827_v50 = vadd.f32 %v811_v33, %v727_v17  ;;  %v1441_v49 = vmul.f32 -1.442695, %v925_v31  ;;  %v812_v34 = vmul.f32 %v2125_v52, %v2229_v20 }
 0x204   : > { %1640 = vpow2.f32 %v1439_v36  ;;  %v983_v7 = vadd.f32 1.0, %v1625_v54  ;;  %v911_v43 = vmul.f32 %v2129_v55, %v2217_v60  ;;  %v729_v0 = vadd.f32 %v713_v32, %v629_v3  ;;  %v892_v20 = vpop.permute.xlu1 %891 }
 0x205   : > { %1642 = vrcp.f32 %v982_v18  ;;  %v828_v53 = vadd.f32 %v812_v34, %v728_v1  ;;  %v1442_v9 = vmul.f32 -1.442695, %v926_v5  ;;  %v912_v15 = vmul.f32 %v2129_v55, %v888_v13 }
 0x206   : > { %1644 = vpow2.f32 %v1440_v38  ;;  %v927_v44 = vadd.f32 %v911_v43, %v827_v50  ;;  %v813_v46 = vmul.f32 %v2125_v52, %v792_v35  ;;  %v913_v36 = vmul.f32 %v2129_v55, %v892_v20 }
 0x207   : > { %1646 = vrcp.f32 %v983_v7  ;;  %v928_v60 = vadd.f32 %v912_v15, %v828_v53  ;;  %v1680_v15 = vld [vmem:[%s1796_s28 + $0x10] sm:$0xff] }
 0x208   : > { %v829_v14 = vadd.f32 %v813_v46, %v729_v0  ;;  %v1443_v16 = vmul.f32 -1.442695, %v927_v44  ;;  %v1678_v0 = vld [vmem:[%s1796_s28] sm:$0xff]  ;;  %v1679_v44 = vld [vmem:[%s1796_s28 + $0x8] sm:$0xff] }
 0x209   : > { %v1444_v56 = vmul.f32 -1.442695, %v928_v60 }
 0x20a   : > { %v1627_v37 = vpop.eup %1626  ;;  %v929_v57 = vadd.f32 %v913_v36, %v829_v14  ;;  %v1681_v14 = vld [vmem:[%s1796_s28 + $0x18] sm:$0xff] }
 0x20b   : > { %1446 = vmatmul.mubr.msk.f32.vlgmr.msra.gmra.mxu1 %vm1034_vm2, %v1627_v37  ;;  %v1629_v10 = vpop.eup %1628 }
 0x20c   : > { %1129 = vmatprep.mubr.f32.mxu1 %v1706_v61  ;;  %1229 = vmatpush1.msra.mxu1 %v1178_v23  ;;  %v1631_v40 = vpop.eup %1630  ;;  %v984_v11 = vadd.f32 1.0, %v1629_v10  ;;  %v1445_v25 = vmul.f32 -1.442695, %v929_v57 }
 0x20d   : > { %1230 = vmatprep.subr.mxu1 %v1177_v21  ;;  %v1633_v45 = vpop.eup %1632 }
 0x20e   : > { %1231 = vmatpush1.msra.mxu1 %v1176_v29  ;;  %v1635_v48 = vpop.eup %1634  ;;  %1648 = vrcp.f32 %v984_v11  ;;  %v985_v63 = vadd.f32 1.0, %v1633_v45 }
 0x20f   : > { %1447 = vmatmul.mubr.msk.f32.gmra.mxu1 %vm1034_vm2, %v1631_v40  ;;  %1232 = vmatprep.subr.mxu1 %v1175_v47  ;;  %v1637_v2 = vpop.eup %1636  ;;  %1650 = vpow2.f32 %v1441_v49 }
 0x210   : > { %1135 = vmatprep.mubr.f32.mxu1 %v1706_v61  ;;  %1233 = vmatpush1.msra.mxu1 %v1174_v51  ;;  %v1639_v8 = vpop.eup %1638  ;;  %1652 = vpow2.f32 %v1442_v9  ;;  %v986_v28 = vadd.f32 1.0, %v1637_v2 }
 0x211   : > { %1234 = vmatprep.subr.mxu1 %v1173_v12  ;;  %v1641_v58 = vpop.eup %1640  ;;  %1654 = vrcp.f32 %v985_v63 }
 0x212   : > { %1235 = vmatpush1.msra.mxu1 %v1172_v42  ;;  %v1643_v24 = vpop.eup %1642  ;;  %1656 = vpow2.f32 %v1443_v16  ;;  %v987_v19 = vadd.f32 1.0, %v1641_v58 }
 0x213   : > { %1448 = vmatmul.mubr.msk.f32.gmra.mxu1 %vm1034_vm2, %v1635_v48  ;;  %v1645_v52 = vpop.eup %1644  ;;  %1658 = vrcp.f32 %v986_v28 }
 0x214   : > { %1141 = vmatprep.mubr.f32.mxu1 %v1706_v61  ;;  %v1647_v6 = vpop.eup %1646  ;;  %1660 = vpow2.f32 %v1444_v56  ;;  %v988_v55 = vadd.f32 1.0, %v1645_v52  ;;  %v1683_v52 = vld [vmem:[%s1796_s28 + $0x28] sm:$0xff] }
 0x215   : > { %1662 = vrcp.f32 %v987_v19 }
 0x216   : > { %1664 = vpow2.f32 %v1445_v25 }
 0x217   : > { %1449 = vmatmul.mubr.msk.f32.gmra.mxu1 %vm1034_vm2, %v1639_v8  ;;  %1666 = vrcp.f32 %v988_v55 }
 0x218   : > { %1147 = vmatprep.mubr.f32.mxu1 %v1706_v61 }
 0x21b   : > { %1450 = vmatmul.mubr.msk.f32.gmra.mxu1 %vm1034_vm2, %v1643_v24  ;;  %v1649_v54 = vpop.eup %1648  ;;  %v1682_v24 = vld [vmem:[%s1796_s28 + $0x20] sm:$0xff] }
 0x21c   : > { %1153 = vmatprep.mubr.f32.mxu1 %v1706_v61  ;;  %v1651_v18 = vpop.eup %1650 }
 0x21d   : > { %v1653_v23 = vpop.eup %1652  ;;  %v989_v26 = vadd.f32 1.0, %v1651_v18 }
 0x21e   : > { %v1655_v37 = vpop.eup %1654  ;;  %v990_v62 = vadd.f32 1.0, %v1653_v23 }
 0x21f   : > { %1451 = vmatmul.mubr.msk.f32.gmra.mxu1 %vm1034_vm2, %v1647_v6  ;;  %v1657_v21 = vpop.eup %1656  ;;  %1668 = vrcp.f32 %v989_v26  ;;  %v1685_v26 = vld [vmem:[%s1796_s28 + $0x38] sm:$0xff] }
 0x220   : > { %1159 = vmatprep.mubr.f32.mxu1 %v1706_v61  ;;  %v1659_v30 = vpop.eup %1658  ;;  %1670 = vrcp.f32 %v990_v62  ;;  %v991_v4 = vadd.f32 1.0, %v1657_v21 }
 0x221   : > { %v1661_v27 = vpop.eup %1660 }
 0x222   : > { %v1663_v29 = vpop.eup %1662  ;;  %v992_v47 = vadd.f32 1.0, %v1661_v27  ;;  %1672 = vrcp.f32 %v991_v4 }
 0x223   : > { %1452 = vmatmul.mubr.msk.f32.gmra.mxu1 %vm1034_vm2, %v1649_v54  ;;  %v1665_v39 = vpop.eup %1664  ;;  %v1684_v54 = vld [vmem:[%s1796_s28 + $0x30] sm:$0xff] }
 0x224   : > { %1165 = vmatprep.mubr.f32.mxu1 %v1706_v61  ;;  %v1667_v38 = vpop.eup %1666  ;;  %1674 = vrcp.f32 %v992_v47  ;;  %v993_v59 = vadd.f32 1.0, %v1665_v39  ;;  %v1687_v39 = vld [vmem:[%s1796_s28 + $0x48] sm:$0xff] }
 0x226   : > { %1676 = vrcp.f32 %v993_v59 }
 0x227   : > { %1453 = vmatmul.mubr.msk.f32.gmra.mxu1 %vm1034_vm2, %v1655_v37 }
 0x228   : > { %1268 = vmatprep.mubr.f32.mxu1 %v1706_v61 }
 0x22b   : > { %1454 = vmatmul.mubr.msk.f32.vlgmr.msra.gmra.mxu1 %vm1034_vm2, %v1659_v30  ;;  %v1686_v30 = vld [vmem:[%s1796_s28 + $0x40] sm:$0xff] }
 0x22c   : > { %1274 = vmatprep.mubr.f32.mxu1 %v1706_v61  ;;  %v1669_v17 = vpop.eup %1668 }
 0x22d   : > { %v1671_v10 = vpop.eup %1670 }
 0x22f   : > { %1455 = vmatmul.mubr.msk.f32.gmra.mxu1 %vm1034_vm2, %v1663_v29  ;;  %v1673_v22 = vpop.eup %1672 }
 0x230   : > { %1280 = vmatprep.mubr.f32.mxu1 %v1706_v61 }
 0x231   : > { %v1675_v7 = vpop.eup %1674 }
 0x233   : > { %1456 = vmatmul.mubr.msk.f32.gmra.mxu1 %vm1034_vm2, %v1667_v38  ;;  %v1677_v51 = vpop.eup %1676 }
 0x234   : > { %1286 = vmatprep.mubr.f32.mxu1 %v1706_v61 }
 0x237   : > { %1457 = vmatmul.mubr.msk.f32.gmra.mxu1 %vm1034_vm2, %v1669_v17  ;;  %v1688_v17 = vld [vmem:[%s1796_s28 + $0x50] sm:$0xff] }
 0x238   : > { %1292 = vmatprep.mubr.f32.mxu1 %v1706_v61 }
 0x23b   : > { %1458 = vmatmul.mubr.msk.f32.gmra.mxu1 %vm1034_vm2, %v1671_v10 }
 0x23c   : > { %1298 = vmatprep.mubr.f32.mxu1 %v1706_v61 }
 0x23f   : > { %1459 = vmatmul.mubr.msk.f32.gmra.mxu1 %vm1034_vm2, %v1673_v22 }
 0x240   : > { %1304 = vmatprep.mubr.f32.mxu1 %v1706_v61 }
 0x243   : > { %1460 = vmatmul.mubr.msk.f32.gmra.mxu1 %vm1034_vm2, %v1675_v7 }
 0x244   : > { %1310 = vmatprep.mubr.f32.mxu1 %v1706_v61 }
 0x247   : > { %1461 = vmatmul.mubr.msk.f32.gmra.mxu1 %vm1034_vm2, %v1677_v51  ;;  %v1689_v51 = vld [vmem:[%s1796_s28 + $0x58] sm:$0xff] }
 0x2cb   : > { %v1125_v31 = vpop.f32.mrf.mxu1 }
 0x2cd   : > { %v1127_v40 = vpop.f32.mrf.mxu1 }
 0x2cf   : > { %v1131_v12 = vpop.f32.mrf.mxu1 }
 0x2d1   : > { %v1133_v41 = vpop.f32.mrf.mxu1 }
 0x2d3   : > { %v1137_v33 = vpop.f32.mrf.mxu1 }
 0x2d5   : > { %v1139_v1 = vpop.f32.mrf.mxu1 }
 0x2d7   : > { %v1143_v32 = vpop.f32.mrf.mxu1 }
 0x2d9   : > { %v1145_v3 = vpop.f32.mrf.mxu1 }
 0x2db   : > { %v1149_v42 = vpop.f32.mrf.mxu1 }
 0x2dd   : > { %v1151_v11 = vpop.f32.mrf.mxu1 }
 0x2df   : > { %v1155_v5 = vpop.f32.mrf.mxu1 }
 0x2e1   : > { %v1157_v50 = vpop.f32.mrf.mxu1 }
 0x2e3   : > { %v2311_v45 = vpop.f32.mrf.mxu1 }
 0x2e5   : > { %v2313_v61 = vpop.f32.mrf.mxu1 }
 0x2e7   : > { %v2315_v13 = vpop.f32.mrf.mxu1 }
 0x2e9   : > { %v2317_v49 = vpop.f32.mrf.mxu1 }
 0x2eb   : > { %v1270_v48 = vpop.f32.mrf.mxu1 }
 0x2ec   : > { %v1317_v34 = vmul.f32 %v1270_v48, %v1125_v31 }
 0x2ed   : > { %v1272_v43 = vpop.f32.mrf.mxu1 }
 0x2ee   : > { %v1333_v35 = vmul.f32 %v1678_v0, %v1317_v34  ;;  %v1318_v53 = vmul.f32 %v1272_v43, %v1127_v40  ;;  %v1693_v34 = vld [vmem:[%s1796_s28 + $0x78] sm:$0xff] }
 0x2ef   : > { %v1276_v9 = vpop.f32.mrf.mxu1 }
 0x2f0   : > { %1349 = vst [vmem:[%s2324_s29] sm:$0xff] %v1333_v35  ;;  %v1334_v2 = vmul.f32 %v1679_v44, %v1318_v53  ;;  %v1319_v63 = vmul.f32 %v1276_v9, %v1131_v12 }
 0x2f1   : > { %v1278_v8 = vpop.f32.mrf.mxu1 }
 0x2f2   : > { %1350 = vst [vmem:[%s2324_s29 + $0x8] sm:$0xff] %v1334_v2  ;;  %v1335_v46 = vmul.f32 %v1680_v15, %v1319_v63  ;;  %v1320_v20 = vmul.f32 %v1278_v8, %v1133_v41  ;;  %v1690_v41 = vld [vmem:[%s1796_s28 + $0x60] sm:$0xff] }
 0x2f3   : > { %v1282_v60 = vpop.f32.mrf.mxu1 }
 0x2f4   : > { %1351 = vst [vmem:[%s2324_s29 + $0x10] sm:$0xff] %v1335_v46  ;;  %v1336_v16 = vmul.f32 %v1681_v14, %v1320_v20  ;;  %v1321_v58 = vmul.f32 %v1282_v60, %v1137_v33 }
 0x2f5   : > { %v1284_v28 = vpop.f32.mrf.mxu1 }
 0x2f6   : > { %1352 = vst [vmem:[%s2324_s29 + $0x18] sm:$0xff] %v1336_v16  ;;  %v1337_v36 = vmul.f32 %v1682_v24, %v1321_v58  ;;  %v1322_v56 = vmul.f32 %v1284_v28, %v1139_v1 }
 0x2f7   : > { %v1288_v57 = vpop.f32.mrf.mxu1 }
 0x2f8   : > { %1353 = vst [vmem:[%s2324_s29 + $0x20] sm:$0xff] %v1337_v36  ;;  %v1338_v19 = vmul.f32 %v1683_v52, %v1322_v56  ;;  %v1323_v6 = vmul.f32 %v1288_v57, %v1143_v32 }
 0x2f9   : > { %v1290_v25 = vpop.f32.mrf.mxu1 }
 0x2fa   : > { %1354 = vst [vmem:[%s2324_s29 + $0x28] sm:$0xff] %v1338_v19  ;;  %v1339_v55 = vmul.f32 %v1684_v54, %v1323_v6  ;;  %v1324_v18 = vmul.f32 %v1290_v25, %v1145_v3  ;;  %v1691_v3 = vld [vmem:[%s1796_s28 + $0x68] sm:$0xff] }
 0x2fb   : > { %v1294_v23 = vpop.f32.mrf.mxu1 }
 0x2fc   : > { %1355 = vst [vmem:[%s2324_s29 + $0x30] sm:$0xff] %v1339_v55  ;;  %v1340_v37 = vmul.f32 %v1685_v26, %v1324_v18  ;;  %v1325_v21 = vmul.f32 %v1294_v23, %v1149_v42 }
 0x2fd   : > { %v1296_v62 = vpop.f32.mrf.mxu1 }
 0x2fe   : > { %1356 = vst [vmem:[%s2324_s29 + $0x38] sm:$0xff] %v1340_v37  ;;  %v1341_v27 = vmul.f32 %v1686_v30, %v1325_v21  ;;  %v1326_v4 = vmul.f32 %v1296_v62, %v1151_v11 }
 0x2ff   : > { %v1300_v29 = vpop.f32.mrf.mxu1 }
 0x300   : > { %1357 = vst [vmem:[%s2324_s29 + $0x40] sm:$0xff] %v1341_v27  ;;  %v1342_v47 = vmul.f32 %v1687_v39, %v1326_v4  ;;  %v1327_v38 = vmul.f32 %v1300_v29, %v1155_v5 }
 0x301   : > { %v1302_v59 = vpop.f32.mrf.mxu1 }
 0x302   : > { %1358 = vst [vmem:[%s2324_s29 + $0x48] sm:$0xff] %v1342_v47  ;;  %v1343_v10 = vmul.f32 %v1688_v17, %v1327_v38  ;;  %v1328_v22 = vmul.f32 %v1302_v59, %v1157_v50  ;;  %v1692_v50 = vld [vmem:[%s1796_s28 + $0x70] sm:$0xff] }
 0x303   : > { %v1306_v7 = vpop.f32.mrf.mxu1 }
 0x304   : > { %1359 = vst [vmem:[%s2324_s29 + $0x50] sm:$0xff] %v1343_v10  ;;  %v1344_v31 = vmul.f32 %v1689_v51, %v1328_v22  ;;  %v1329_v40 = vmul.f32 %v1306_v7, %v2311_v45 }
 0x305   : > { %v1308_v12 = vpop.f32.mrf.mxu1 }
 0x306   : > { %1360 = vst [vmem:[%s2324_s29 + $0x58] sm:$0xff] %v1344_v31  ;;  %v1345_v33 = vmul.f32 %v1690_v41, %v1329_v40  ;;  %v1330_v1 = vmul.f32 %v1308_v12, %v2313_v61 }
 0x307   : > { %v1312_v32 = vpop.f32.mrf.mxu1 }
 0x308   : > { %1361 = vst [vmem:[%s2324_s29 + $0x60] sm:$0xff] %v1345_v33  ;;  %v1346_v42 = vmul.f32 %v1691_v3, %v1330_v1  ;;  %v1331_v11 = vmul.f32 %v1312_v32, %v2315_v13 }
 0x309   : > { %v1314_v5 = vpop.f32.mrf.mxu1 }
 0x30a   : > { %1362 = vst [vmem:[%s2324_s29 + $0x68] sm:$0xff] %v1346_v42  ;;  %v1347_v48 = vmul.f32 %v1692_v50, %v1331_v11  ;;  %v1332_v45 = vmul.f32 %v1314_v5, %v2317_v49 }
 0x30c   : > { %1363 = vst [vmem:[%s2324_s29 + $0x70] sm:$0xff] %v1347_v48  ;;  %v1348_v43 = vmul.f32 %v1693_v34, %v1332_v45 }
 0x30e   : > { %1364 = vst [vmem:[%s2324_s29 + $0x78] sm:$0xff] %v1348_v43 }
 0x30f PF: > { %s17_s24 = sadd.s32 1, %s1700_s24  }
 0x310   : > { %p14_p4 = scmp.ge.s32.totalorder %s17_s24, 4  }
 0x312   :  { %16 = sbr.rel (!%p14_p4) target bundleno = 1 (0x1), region = 78 }

</bundles_post_ra>
